<compile_context>
chip_gen: v7x
topology: tpu7x:2x2x1
jax: 0.10.0
libtpu: 0.0.40
codegen_flags: <defaults>
</compile_context>

<pallas_src>
import jax
import jax.numpy as jnp
from jax.experimental import pallas as pl
from jax.experimental.pallas import tpu as pltpu

# ---------------- problem sizes (small, consistent with the module) ----------
DIN = 16                  # per-agent observation/input size
N_AGENTS = 2              # the self_embed swap in the reference code needs 2
BS = 4                    # episode batch size
B = BS * N_AGENTS         # flattened batch (= 8, exactly one sublane tile)
LAT = 8                   # latent_dim
H = 32                    # rnn_hidden_dim
NH = 32                   # nn_hidden_dim
VAR_FLOOR = 0.002
BN_EPS = 1e-5
LEAKY_SLOPE = 0.01

# packed input slab (lane-dense 128): [x 0:16 | eps 16:24 | pad]
IN_WIDTH = 128
# fused x-side layer-1 lanes: [embed 0:32 | opp0_x 32:64 | opp1_x 64:96 | fc1 96:128]
L1X_WIDTH = 4 * NH
# fused h-side recurrent weight lanes: [opp0_h 0:32 | opp1_h 32:64 | pad | whh 128:224]
WHR_OPP = 0
WHR_GRU = 128
WHR_WIDTH = WHR_GRU + 3 * H           # 224
# per-chunk scratch of x-only pre-activations: [opp_x 0:64 | pad | gi 128:224 | pad]
PRE_OPP = 0
PRE_GI = 128
PRE_WIDTH = 256
# small-vector slab width
VEC_WIDTH = 256
# packed output lane layout (128-lane slab)
OUT_H = 0                              # h      lanes   0:32
OUT_OPP = 32                           # opp0   lanes  32:48, opp1 48:64
OUT_LAT = 64                           # latent lanes  64:72
OUT_EMB = 72                           # embed  lanes  72:88
OUT_USED = 88
OUT_WIDTH = 128


# ------------------------------ Pallas kernel --------------------------------
def _make_role_kernel(C):
    """Build a kernel that processes C timesteps per grid step."""
    CB = C * B

    def kernel(xe_ref, h0_ref, wx_ref, wih_ref, ew2_ref, whr_ref, w2o_ref,
               vec_ref, out_ref, pre_scr, h_scr):
        c = pl.program_id(0)

        @pl.when(c == 0)
        def _():
            h_scr[...] = h0_ref[...]

        vecs = vec_ref[...]
        bx = vecs[0:1, 0:L1X_WIDTH]                      # (1,128) fused L1 x-biases
        bih = vecs[1:2, 0:3 * H]                         # (1, 96) GRU input bias
        eb2 = vecs[1:2, 3 * H:3 * H + 2 * LAT]           # (1, 16) embed L2 bias
        b2o = vecs[1:2, 3 * H + 2 * LAT:3 * H + 6 * LAT]  # (1, 32) opp L2 biases
        bhh = vecs[2:3, 0:3 * H]                         # (1, 96) GRU hidden bias
        gamma_e = vecs[3:4, 0:NH]                        # (1, 32)
        beta_e = vecs[3:4, NH:2 * NH]                    # (1, 32)
        gamma_o = vecs[3:4, 2 * NH:4 * NH]               # (1, 64)
        beta_o = vecs[4:5, 0:2 * NH]                     # (1, 64)

        # ----------- batched x-only pass over the whole chunk (once) ---------
        xe = xe_ref[...]                                 # (CB, 128)
        x = xe[:, :DIN]                                  # (CB, 16)
        eps = xe[:, DIN:DIN + LAT]                       # (CB, 8)

        zx = jnp.dot(x, wx_ref[...], preferred_element_type=jnp.float32) + bx

        # embed branch; BatchNorm uses per-timestep batch stats over its B rows
        ze = zx[:, :NH].reshape(C, B, NH)
        me = jnp.mean(ze, axis=1, keepdims=True)
        ve = jnp.mean((ze - me) ** 2, axis=1, keepdims=True)
        zne = ((ze - me) * jax.lax.rsqrt(ve + BN_EPS)).reshape(CB, NH)
        zne = zne * gamma_e + beta_e
        a_e = jnp.where(zne > 0, zne, LEAKY_SLOPE * zne)
        emb = jnp.dot(a_e, ew2_ref[...], preferred_element_type=jnp.float32) + eb2
        lane16 = jax.lax.broadcasted_iota(jnp.int32, emb.shape, 1)
        emb_all = jnp.where(lane16 < LAT, emb, jnp.maximum(jnp.exp(emb), VAR_FLOOR))
        lat = emb_all[:, :LAT] + jnp.sqrt(emb_all[:, LAT:]) * eps

        # fc1 -> ReLU -> GRU input projection (all x-only)
        xr = jnp.maximum(zx[:, 3 * NH:4 * NH], 0.0)
        gi = jnp.dot(xr, wih_ref[...], preferred_element_type=jnp.float32) + bih

        # stash x-only pre-activations needed on the recurrent path
        pre_scr[:, PRE_OPP:PRE_OPP + 2 * NH] = zx[:, NH:3 * NH]
        pre_scr[:, PRE_GI:PRE_GI + 3 * H] = gi

        # x-only output lanes and zero pad written ONCE per chunk
        # (lanes 0:64 are fully rewritten by the recurrent loop below)
        out_ref[:, OUT_LAT:OUT_LAT + LAT] = lat
        out_ref[:, OUT_EMB:OUT_EMB + 2 * LAT] = emb_all
        out_ref[:, OUT_USED:OUT_WIDTH] = jnp.zeros((CB, OUT_WIDTH - OUT_USED),
                                                   jnp.float32)

        # constants hoisted out of the per-step loop
        lane32 = jax.lax.broadcasted_iota(jnp.int32, (B, 4 * LAT), 1)
        is_mu32 = (lane32 & (2 * LAT - 1)) < LAT          # 2*LAT is a power of 2

        # --------------- serial recurrence over the C timesteps --------------
        def step(i, h):
            r0 = pl.multiple_of(i * B, B)
            oppx = pre_scr[pl.ds(r0, B), PRE_OPP:PRE_OPP + 2 * NH]   # (B, 64)
            gi_t = pre_scr[pl.ds(r0, B), PRE_GI:PRE_GI + 3 * H]      # (B, 96)

            gh = jnp.dot(h, whr_ref[...],
                         preferred_element_type=jnp.float32)         # (B, 224)

            # opp0 | opp1: layer-1 h-part + BN(batch stats) + LeakyReLU + layer-2
            z_o = oppx + gh[:, WHR_OPP:WHR_OPP + 2 * NH]
            mo = jnp.mean(z_o, axis=0, keepdims=True)
            vo = jnp.mean((z_o - mo) ** 2, axis=0, keepdims=True)
            zno = (z_o - mo) * jax.lax.rsqrt(vo + BN_EPS) * gamma_o + beta_o
            a_o = jnp.where(zno > 0, zno, LEAKY_SLOPE * zno)
            opp = jnp.dot(a_o, w2o_ref[...],
                          preferred_element_type=jnp.float32) + b2o  # (B, 32)
            opp = jnp.where(is_mu32, opp, jnp.maximum(jnp.exp(opp), VAR_FLOOR))

            # GRUCell (PyTorch gate order r, z, n); r/z share one fused sigmoid
            gh_g = gh[:, WHR_GRU:WHR_GRU + 3 * H] + bhh               # (B, 96)
            grz = jax.nn.sigmoid(gi_t[:, :2 * H] + gh_g[:, :2 * H])
            r = grz[:, :H]
            zg = grz[:, H:]
            n = jnp.tanh(gi_t[:, 2 * H:] + r * gh_g[:, 2 * H:])
            hnew = (1.0 - zg) * n + zg * h

            out_ref[pl.ds(r0, B), OUT_H:OUT_H + H] = hnew
            out_ref[pl.ds(r0, B), OUT_OPP:OUT_OPP + 4 * LAT] = opp
            return hnew

        h_last = jax.lax.fori_loop(0, C, step, h_scr[...],
                                   unroll=2 if C % 2 == 0 else 1)
        h_scr[...] = h_last                      # carry hidden state across chunks

    return kernel


# ------------------------------ wrappers --------------------------------------
def _pick_chunk(T, target):
    c = max(1, min(target, T))
    while T % c:
        c -= 1
    return c


def _split(out):
    h = out[..., OUT_H:OUT_H + H]
    opp0 = out[..., OUT_OPP:OUT_OPP + 2 * LAT]
    opp1 = out[..., OUT_OPP + 2 * LAT:OUT_OPP + 4 * LAT]
    lat = out[..., OUT_LAT:OUT_LAT + LAT]
    emb = out[..., OUT_EMB:OUT_EMB + 2 * LAT]
    return lat, h, emb, opp0, opp1


def role_learner_rollout(x_seq, h0, eps_seq, packed, *, chunk=128):
    """Run T RoleLearner forward steps; CHUNK timesteps per grid step.

    x_seq: (T, B, DIN), eps_seq: (T, B, LAT), h0: (B, H).
    Returns (T, B, 128) packed result slab (see OUT_* lane offsets).
    """
    T = x_seq.shape[0]
    C = _pick_chunk(T, chunk)
    CB = C * B
    wx, wih, ew2, whr, w2o, vecs = packed

    xs = x_seq.reshape(T * B, DIN).astype(jnp.float32)
    es = eps_seq.reshape(T * B, LAT).astype(jnp.float32)
    # one lane-dense (T*B, 128) input slab: x in lanes 0:16, eps in 16:24
    xe = jnp.concatenate(
        [xs, es, jnp.zeros((T * B, IN_WIDTH - DIN - LAT), jnp.float32)], axis=1)
    h0 = h0.astype(jnp.float32)

    out = pl.pallas_call(
        _make_role_kernel(C),
        out_shape=jax.ShapeDtypeStruct((T * B, OUT_WIDTH), jnp.float32),
        grid_spec=pltpu.PrefetchScalarGridSpec(
            num_scalar_prefetch=0,
            grid=(T // C,),
            in_specs=[
                pl.BlockSpec((CB, IN_WIDTH), lambda c: (c, 0)),      # packed x|eps
                pl.BlockSpec((B, H), lambda c: (0, 0)),              # h0 (once)
                pl.BlockSpec((DIN, L1X_WIDTH), lambda c: (0, 0)),    # Wx fused
                pl.BlockSpec((H, 3 * H), lambda c: (0, 0)),          # GRU Wih
                pl.BlockSpec((NH, 2 * LAT), lambda c: (0, 0)),       # embed L2
                pl.BlockSpec((H, WHR_WIDTH), lambda c: (0, 0)),      # Wh fused
                pl.BlockSpec((2 * NH, 4 * LAT), lambda c: (0, 0)),   # opp L2 blockdiag
                pl.BlockSpec((8, VEC_WIDTH), lambda c: (0, 0)),      # vector slab
            ],
            out_specs=pl.BlockSpec((CB, OUT_WIDTH), lambda c: (c, 0)),
            scratch_shapes=[pltpu.VMEM((CB, PRE_WIDTH), jnp.float32),   # x-only pre
                            pltpu.VMEM((B, H), jnp.float32)],           # h carry
        ),
        compiler_params=pltpu.CompilerParams(
            # time axis is a true recurrence (h carry) -> must run sequentially
            dimension_semantics=("arbitrary",)),
    )(xe, h0, wx, wih, ew2, whr, w2o, vecs)
    return out.reshape(T, B, OUT_WIDTH)


@jax.jit
def role_learner_forward(inputs, hidden_state, eps, packed):
    """Pallas-backed RoleLearner.forward (train_mode=False), single step."""
    x = inputs.reshape(-1, DIN).astype(jnp.float32)
    h_in = hidden_state.reshape(-1, H).astype(jnp.float32)
    out = role_learner_rollout(x[None], h_in, eps[None], packed)[0]   # (B, 128)
    lat, h, emb, opp0, opp1 = _split(out)

    # glue reshapes / agent swap fused into this jit (no standalone launches)
    latent = jnp.transpose(lat.reshape(-1, N_AGENTS, LAT), (1, 0, 2))
    se0 = emb.reshape(-1, N_AGENTS, 2 * LAT)
    se1 = jnp.concatenate([se0[:, 1:2], se0[:, 0:1]], axis=1)
    self_embed0 = se0.reshape(-1, 2 * LAT)
    self_embed1 = se1.reshape(-1, 2 * LAT)

    zero = jnp.float32(0.0)   # train_mode=False -> loss == ce_loss == c_dis_loss == 0
    return latent, h, (self_embed0, self_embed1, opp0, opp1), zero, zero, zero


# --------------------------- parameter construction ---------------------------
def make_params(key):
    def dense(k, fan_in, fan_out, scale=0.1):
        k1, k2 = jax.random.split(k)
        w = jax.random.normal(k1, (fan_in, fan_out), jnp.float32) * scale
        b = jax.random.normal(k2, (1, fan_out), jnp.float32) * scale
        return w, b

    ks = jax.random.split(key, 12)
    ew1, eb1 = dense(ks[0], DIN, NH)
    eg = jnp.ones((1, NH), jnp.float32)
    ebt = jnp.zeros((1, NH), jnp.float32)
    ew2, eb2 = dense(ks[1], NH, 2 * LAT)
    o0w1, o0b1 = dense(ks[2], H + DIN, NH)
    o0g = jnp.ones((1, NH), jnp.float32)
    o0bt = jnp.zeros((1, NH), jnp.float32)
    o0w2, o0b2 = dense(ks[3], NH, 2 * LAT)
    o1w1, o1b1 = dense(ks[4], H + DIN, NH)
    o1g = jnp.ones((1, NH), jnp.float32)
    o1bt = jnp.zeros((1, NH), jnp.float32)
    o1w2, o1b2 = dense(ks[5], NH, 2 * LAT)
    fw, fb = dense(ks[6], DIN, H)
    # GRUCell (gate order r, z, n), weights pre-transposed to (in, 3H)
    wih, bih = dense(ks[7], H, 3 * H)
    whh, bhh = dense(ks[8], H, 3 * H)

    return (ew1, eb1, eg, ebt, ew2, eb2,
            o0w1, o0b1, o0g, o0bt, o0w2, o0b2,
            o1w1, o1b1, o1g, o1bt, o1w2, o1b2,
            fw, fb, wih, bih, whh, bhh)


def pack_params(params):
    """Pack the 24 small parameter tensors into 6 lane-dense VMEM slabs."""
    (ew1, eb1, eg, ebt, ew2, eb2,
     o0w1, o0b1, o0g, o0bt, o0w2, o0b2,
     o1w1, o1b1, o1g, o1bt, o1w2, o1b2,
     fw, fb, wih, bih, whh, bhh) = params

    # opp layer-1 weights consume cat([h, x]); split into h rows and x rows
    o0w1_h, o0w1_x = o0w1[:H], o0w1[H:]
    o1w1_h, o1w1_x = o1w1[:H], o1w1[H:]

    # x-side fused layer-1: lanes [embed | opp0_x | opp1_x | fc1]  -> (16, 128)
    wx = jnp.concatenate([ew1, o0w1_x, o1w1_x, fw], axis=1)
    bx = jnp.concatenate([eb1, o0b1, o1b1, fb], axis=1)                  # (1, 128)

    # h-side fused recurrent weight: [opp0_h | opp1_h | pad | whh] -> (32, 224)
    whr = jnp.concatenate(
        [o0w1_h, o1w1_h, jnp.zeros((H, WHR_GRU - 2 * NH), jnp.float32), whh],
        axis=1)

    # opp layer-2 block diagonal (64, 32)
    w2o = jnp.zeros((2 * NH, 4 * LAT), jnp.float32)
    w2o = w2o.at[0:NH, 0:2 * LAT].set(o0w2)
    w2o = w2o.at[NH:2 * NH, 2 * LAT:4 * LAT].set(o1w2)
    b2o = jnp.concatenate([o0b2, o1b2], axis=1)                          # (1, 32)

    # small-vector slab (8, 256)
    vecs = jnp.zeros((8, VEC_WIDTH), jnp.float32)
    vecs = vecs.at[0, 0:L1X_WIDTH].set(bx[0])
    vecs = vecs.at[1, 0:3 * H].set(bih[0])
    vecs = vecs.at[1, 3 * H:3 * H + 2 * LAT].set(eb2[0])
    vecs = vecs.at[1, 3 * H + 2 * LAT:3 * H + 6 * LAT].set(b2o[0])
    vecs = vecs.at[2, 0:3 * H].set(bhh[0])
    vecs = vecs.at[3, 0:NH].set(eg[0])
    vecs = vecs.at[3, NH:2 * NH].set(ebt[0])
    vecs = vecs.at[3, 2 * NH:4 * NH].set(jnp.concatenate([o0g, o1g], axis=1)[0])
    vecs = vecs.at[4, 0:2 * NH].set(jnp.concatenate([o0bt, o1bt], axis=1)[0])
    return wx, wih, ew2, whr, w2o, vecs


# ------------------------------ pure-JAX reference ----------------------------
def _ref_forward(x, h, eps, params):
    (ew1, eb1, eg, ebt, ew2, eb2,
     o0w1, o0b1, o0g, o0bt, o0w2, o0b2,
     o1w1, o1b1, o1g, o1bt, o1w2, o1b2,
     fw, fb, wih, bih, whh, bhh) = params

    def mlp(inp, w1, b1, g, bt, w2, b2):
        z = inp @ w1 + b1
        m = jnp.mean(z, axis=0, keepdims=True)
        v = jnp.mean((z - m) ** 2, axis=0, keepdims=True)
        zn = (z - m) / jnp.sqrt(v + BN_EPS) * g + bt
        a = jnp.where(zn > 0, zn, LEAKY_SLOPE * zn)
        return a @ w2 + b2

    def clamp_half(e):
        return jnp.concatenate(
            [e[:, :LAT], jnp.maximum(jnp.exp(e[:, LAT:]), VAR_FLOOR)], 1)

    emb = clamp_half(mlp(x, ew1, eb1, eg, ebt, ew2, eb2))
    lat = emb[:, :LAT] + jnp.sqrt(emb[:, LAT:]) * eps
    hx = jnp.concatenate([h, x], axis=1)
    o0 = clamp_half(mlp(hx, o0w1, o0b1, o0g, o0bt, o0w2, o0b2))
    o1 = clamp_half(mlp(hx, o1w1, o1b1, o1g, o1bt, o1w2, o1b2))
    xr = jnp.maximum(x @ fw + fb, 0.0)
    gi = xr @ wih + bih
    gh = h @ whh + bhh
    r = jax.nn.sigmoid(gi[:, :H] + gh[:, :H])
    z = jax.nn.sigmoid(gi[:, H:2 * H] + gh[:, H:2 * H])
    n = jnp.tanh(gi[:, 2 * H:] + r * gh[:, 2 * H:])
    hnew = (1.0 - z) * n + z * h
    return lat, hnew, emb, o0, o1


def _ref_rollout(x_seq, h0, eps_seq, params):
    def step(h, xe):
        x, e = xe
        lat, hn, emb, o0, o1 = _ref_forward(x, h, e, params)
        return hn, (lat, hn, emb, o0, o1)
    _, ys = jax.lax.scan(step, h0, (x_seq, eps_seq))
    return ys


# ------------------------------------ main ------------------------------------
if __name__ == "__main__":
    key = jax.random.PRNGKey(0)
    k_in, k_h, k_eps, k_p, k_xT, k_eT = jax.random.split(key, 6)

    params = make_params(k_p)
    packed = pack_params(params)
    tol = dict(atol=1e-4, rtol=1e-4)

    # ---- single step: exact module-forward semantics ----
    inputs = jax.random.normal(k_in, (BS, N_AGENTS, DIN), jnp.float32)
    hidden_state = jax.random.normal(k_h, (BS, N_AGENTS, H), jnp.float32)
    eps = jax.random.normal(k_eps, (B, LAT), jnp.float32)

    latent, h, latent_dis, loss, ce_loss, c_dis_loss = jax.block_until_ready(
        role_learner_forward(inputs, hidden_state, eps, packed))

    x2 = inputs.reshape(-1, DIN)
    h2 = hidden_state.reshape(-1, H)
    r_lat, r_h, r_emb, r_o0, r_o1 = _ref_forward(x2, h2, eps, params)
    assert jnp.allclose(latent, jnp.transpose(
        r_lat.reshape(-1, N_AGENTS, LAT), (1, 0, 2)), **tol)
    assert jnp.allclose(h, r_h, **tol)
    assert jnp.allclose(latent_dis[0], r_emb, **tol)
    r_emb3 = r_emb.reshape(-1, N_AGENTS, 2 * LAT)
    r_se1 = jnp.concatenate([r_emb3[:, 1:2], r_emb3[:, 0:1]], 1).reshape(-1, 2 * LAT)
    assert jnp.allclose(latent_dis[1], r_se1, **tol)
    assert jnp.allclose(latent_dis[2], r_o0, **tol)
    assert jnp.allclose(latent_dis[3], r_o1, **tol)

    # ---- chunked T-step rollout (16 timesteps per grid step, h carried across
    #      chunks; exercises the batched x-only pass + serial recurrence) ----
    T = 48
    x_seq = jax.random.normal(k_xT, (T, B, DIN), jnp.float32)
    eps_seq = jax.random.normal(k_eT, (T, B, LAT), jnp.float32)
    roll = jax.jit(role_learner_rollout, static_argnames=("chunk",))
    out = jax.block_until_ready(roll(x_seq, h2, eps_seq, packed, chunk=16))
    k_lat, k_h_all, k_emb, k_o0, k_o1 = _split(out)
    s_lat, s_h, s_emb, s_o0, s_o1 = _ref_rollout(x_seq, h2, eps_seq, params)
    assert jnp.allclose(k_lat, s_lat, **tol)
    assert jnp.allclose(k_h_all, s_h, **tol)
    assert jnp.allclose(k_emb, s_emb, **tol)
    assert jnp.allclose(k_o0, s_o0, **tol)
    assert jnp.allclose(k_o1, s_o1, **tol)

    print("KERNEL_OK")
</pallas_src>

<mosaic_0001>
module attributes {stable_mosaic.version = 11 : i64} {
  func.func @kernel(%arg0: i32, %arg1: memref<8x128xf32, #tpu.memory_space<vmem>>, %arg2: memref<8x32xf32, #tpu.memory_space<vmem>>, %arg3: memref<16x128xf32, #tpu.memory_space<vmem>>, %arg4: memref<32x96xf32, #tpu.memory_space<vmem>>, %arg5: memref<32x16xf32, #tpu.memory_space<vmem>>, %arg6: memref<32x224xf32, #tpu.memory_space<vmem>>, %arg7: memref<64x32xf32, #tpu.memory_space<vmem>>, %arg8: memref<8x256xf32, #tpu.memory_space<vmem>>, %arg9: memref<8x128xf32, #tpu.memory_space<vmem>>, %arg10: memref<8x256xf32, #tpu.memory_space<vmem>>, %arg11: memref<8x32xf32, #tpu.memory_space<vmem>>) attributes {dimension_semantics = [#tpu.dimension_semantics<arbitrary>], iteration_bounds = array<i64: 1>, scalar_prefetch = 0 : i64, scratch_operands = 2 : i64, tpu.core_type = #tpu.core_type<tc>, window_params = [{transform_indices = @transform_0, window_bounds = array<i64: 8, 128>}, {pipeline_mode = #tpu.pipeline_mode<synchronous>, transform_indices = @transform_1, window_bounds = array<i64: 8, 32>}, {pipeline_mode = #tpu.pipeline_mode<synchronous>, transform_indices = @transform_2, window_bounds = array<i64: 16, 128>}, {pipeline_mode = #tpu.pipeline_mode<synchronous>, transform_indices = @transform_3, window_bounds = array<i64: 32, 96>}, {pipeline_mode = #tpu.pipeline_mode<synchronous>, transform_indices = @transform_4, window_bounds = array<i64: 32, 16>}, {pipeline_mode = #tpu.pipeline_mode<synchronous>, transform_indices = @transform_5, window_bounds = array<i64: 32, 224>}, {pipeline_mode = #tpu.pipeline_mode<synchronous>, transform_indices = @transform_6, window_bounds = array<i64: 64, 32>}, {pipeline_mode = #tpu.pipeline_mode<synchronous>, transform_indices = @transform_7, window_bounds = array<i64: 8, 256>}, {transform_indices = @transform_8, window_bounds = array<i64: 8, 128>}]} {
    %c0_i32 = arith.constant 0 : i32
    %0 = arith.cmpi eq, %arg0, %c0_i32 : i32
    %1 = arith.extui %0 : i1 to i32
    %c0_i32_0 = arith.constant 0 : i32
    %2 = arith.cmpi ne, %1, %c0_i32_0 : i32
    scf.if %2 {
      %c0_54 = arith.constant 0 : index
      %c0_55 = arith.constant 0 : index
      %159 = vector.load %arg2[%c0_54, %c0_55] : memref<8x32xf32, #tpu.memory_space<vmem>>, vector<8x32xf32>
      %c0_56 = arith.constant 0 : index
      %c0_57 = arith.constant 0 : index
      %160 = vector.load %arg11[%c0_56, %c0_57] : memref<8x32xf32, #tpu.memory_space<vmem>>, vector<8x32xf32>
      tpu.vector_store %arg11[%c0_56, %c0_57], %159 {strides = array<i32>} : memref<8x32xf32, #tpu.memory_space<vmem>>, vector<8x32xf32>,
    } else {
    }
    %c0 = arith.constant 0 : index
    %c0_1 = arith.constant 0 : index
    %3 = vector.load %arg8[%c0, %c0_1] : memref<8x256xf32, #tpu.memory_space<vmem>>, vector<8x256xf32>
    %4 = vector.extract_strided_slice %3 {offsets = [0, 0], sizes = [1, 128], strides = [1, 1]} : vector<8x256xf32> to vector<1x128xf32>
    %5 = vector.extract_strided_slice %3 {offsets = [1, 0], sizes = [1, 96], strides = [1, 1]} : vector<8x256xf32> to vector<1x96xf32>
    %6 = vector.extract_strided_slice %3 {offsets = [1, 96], sizes = [1, 16], strides = [1, 1]} : vector<8x256xf32> to vector<1x16xf32>
    %7 = vector.extract_strided_slice %3 {offsets = [1, 112], sizes = [1, 32], strides = [1, 1]} : vector<8x256xf32> to vector<1x32xf32>
    %8 = vector.extract_strided_slice %3 {offsets = [2, 0], sizes = [1, 96], strides = [1, 1]} : vector<8x256xf32> to vector<1x96xf32>
    %9 = vector.extract_strided_slice %3 {offsets = [3, 0], sizes = [1, 32], strides = [1, 1]} : vector<8x256xf32> to vector<1x32xf32>
    %10 = vector.extract_strided_slice %3 {offsets = [3, 32], sizes = [1, 32], strides = [1, 1]} : vector<8x256xf32> to vector<1x32xf32>
    %11 = vector.extract_strided_slice %3 {offsets = [3, 64], sizes = [1, 64], strides = [1, 1]} : vector<8x256xf32> to vector<1x64xf32>
    %12 = vector.extract_strided_slice %3 {offsets = [4, 0], sizes = [1, 64], strides = [1, 1]} : vector<8x256xf32> to vector<1x64xf32>
    %c0_2 = arith.constant 0 : index
    %c0_3 = arith.constant 0 : index
    %13 = vector.load %arg1[%c0_2, %c0_3] : memref<8x128xf32, #tpu.memory_space<vmem>>, vector<8x128xf32>
    %14 = vector.extract_strided_slice %13 {offsets = [0, 0], sizes = [8, 16], strides = [1, 1]} : vector<8x128xf32> to vector<8x16xf32>
    %15 = vector.extract_strided_slice %13 {offsets = [0, 16], sizes = [8, 8], strides = [1, 1]} : vector<8x128xf32> to vector<8x8xf32>
    %c0_4 = arith.constant 0 : index
    %c0_5 = arith.constant 0 : index
    %16 = vector.load %arg3[%c0_4, %c0_5] : memref<16x128xf32, #tpu.memory_space<vmem>>, vector<16x128xf32>
    %cst = arith.constant dense<0.000000e+00> : vector<8x128xf32>
    %17 = tpu.matmul %14, %16, %cst {dimension_numbers = #tpu.dot_dimension_numbers<[1], [0], [0], [1], [0, 0, 1, 1], [], []>} : vector<8x16xf32>, vector<16x128xf32>, vector<8x128xf32> -> vector<8x128xf32>
    %18 = vector.broadcast %4 : vector<1x128xf32> to vector<8x128xf32>
    %19 = arith.addf %17, %18 : vector<8x128xf32>
    %20 = vector.extract_strided_slice %19 {offsets = [0, 0], sizes = [8, 32], strides = [1, 1]} : vector<8x128xf32> to vector<8x32xf32>
    %21 = vector.shape_cast %20 : vector<8x32xf32> to vector<1x8x32xf32>
    %cst_6 = arith.constant dense<0.000000e+00> : vector<1x32xf32>
    %22 = vector.multi_reduction <add>, %21, %cst_6 [1] : vector<1x8x32xf32> to vector<1x32xf32>
    %23 = vector.shape_cast %22 : vector<1x32xf32> to vector<1x1x32xf32>
    %cst_7 = arith.constant 8.000000e+00 : f32
    %24 = vector.broadcast %cst_7 : f32 to vector<1x1x32xf32>
    %25 = arith.divf %23, %24 : vector<1x1x32xf32>
    %26 = vector.broadcast %25 : vector<1x1x32xf32> to vector<1x8x32xf32>
    %27 = arith.subf %21, %26 : vector<1x8x32xf32>
    %28 = arith.mulf %27, %27 : vector<1x8x32xf32>
    %cst_8 = arith.constant dense<0.000000e+00> : vector<1x32xf32>
    %29 = vector.multi_reduction <add>, %28, %cst_8 [1] : vector<1x8x32xf32> to vector<1x32xf32>
    %30 = vector.shape_cast %29 : vector<1x32xf32> to vector<1x1x32xf32>
    %cst_9 = arith.constant 8.000000e+00 : f32
    %31 = vector.broadcast %cst_9 : f32 to vector<1x1x32xf32>
    %32 = arith.divf %30, %31 : vector<1x1x32xf32>
    %33 = vector.broadcast %25 : vector<1x1x32xf32> to vector<1x8x32xf32>
    %34 = arith.subf %21, %33 : vector<1x8x32xf32>
    %cst_10 = arith.constant 9.99999974E-6 : f32
    %35 = vector.broadcast %cst_10 : f32 to vector<1x1x32xf32>
    %36 = arith.addf %32, %35 : vector<1x1x32xf32>
    %37 = math.rsqrt %36 : vector<1x1x32xf32>
    %38 = vector.broadcast %37 : vector<1x1x32xf32> to vector<1x8x32xf32>
    %39 = arith.mulf %34, %38 : vector<1x8x32xf32>
    %40 = vector.shape_cast %39 : vector<1x8x32xf32> to vector<8x32xf32>
    %41 = vector.broadcast %9 : vector<1x32xf32> to vector<8x32xf32>
    %42 = arith.mulf %40, %41 : vector<8x32xf32>
    %43 = vector.broadcast %10 : vector<1x32xf32> to vector<8x32xf32>
    %44 = arith.addf %42, %43 : vector<8x32xf32>
    %cst_11 = arith.constant 0.000000e+00 : f32
    %45 = vector.broadcast %cst_11 : f32 to vector<8x32xf32>
    %46 = arith.cmpf ogt, %44, %45 : vector<8x32xf32>
    %cst_12 = arith.constant 0.00999999977 : f32
    %47 = vector.broadcast %cst_12 : f32 to vector<8x32xf32>
    %48 = arith.mulf %47, %44 : vector<8x32xf32>
    %49 = arith.select %46, %44, %48 : vector<8x32xi1>, vector<8x32xf32>
    %c0_13 = arith.constant 0 : index
    %c0_14 = arith.constant 0 : index
    %50 = vector.load %arg5[%c0_13, %c0_14] : memref<32x16xf32, #tpu.memory_space<vmem>>, vector<32x16xf32>
    %cst_15 = arith.constant dense<0.000000e+00> : vector<8x16xf32>
    %51 = tpu.matmul %49, %50, %cst_15 {dimension_numbers = #tpu.dot_dimension_numbers<[1], [0], [0], [1], [0, 0, 1, 1], [], []>} : vector<8x32xf32>, vector<32x16xf32>, vector<8x16xf32> -> vector<8x16xf32>
    %52 = vector.broadcast %6 : vector<1x16xf32> to vector<8x16xf32>
    %53 = arith.addf %51, %52 : vector<8x16xf32>
    %54 = tpu.iota {dimensions = array<i32: 1>} : vector<8x16xi32>
    %c8_i32 = arith.constant 8 : i32
    %55 = vector.broadcast %c8_i32 : i32 to vector<8x16xi32>
    %56 = arith.cmpi slt, %54, %55 : vector<8x16xi32>
    %57 = math.exp %53 : vector<8x16xf32>
    %cst_16 = arith.constant 2.000000e-03 : f32
    %58 = vector.broadcast %cst_16 : f32 to vector<8x16xf32>
    %59 = arith.maximumf %57, %58 : vector<8x16xf32>
    %60 = arith.select %56, %53, %59 : vector<8x16xi1>, vector<8x16xf32>
    %61 = vector.extract_strided_slice %60 {offsets = [0, 0], sizes = [8, 8], strides = [1, 1]} : vector<8x16xf32> to vector<8x8xf32>
    %62 = vector.extract_strided_slice %60 {offsets = [0, 8], sizes = [8, 8], strides = [1, 1]} : vector<8x16xf32> to vector<8x8xf32>
    %63 = math.sqrt %62 : vector<8x8xf32>
    %64 = arith.mulf %63, %15 : vector<8x8xf32>
    %65 = arith.addf %61, %64 : vector<8x8xf32>
    %66 = vector.extract_strided_slice %19 {offsets = [0, 96], sizes = [8, 32], strides = [1, 1]} : vector<8x128xf32> to vector<8x32xf32>
    %cst_17 = arith.constant 0.000000e+00 : f32
    %67 = vector.broadcast %cst_17 : f32 to vector<8x32xf32>
    %68 = arith.maximumf %66, %67 : vector<8x32xf32>
    %c0_18 = arith.constant 0 : index
    %c0_19 = arith.constant 0 : index
    %69 = vector.load %arg4[%c0_18, %c0_19] : memref<32x96xf32, #tpu.memory_space<vmem>>, vector<32x96xf32>
    %cst_20 = arith.constant dense<0.000000e+00> : vector<8x96xf32>
    %70 = tpu.matmul %68, %69, %cst_20 {dimension_numbers = #tpu.dot_dimension_numbers<[1], [0], [0], [1], [0, 0, 1, 1], [], []>} : vector<8x32xf32>, vector<32x96xf32>, vector<8x96xf32> -> vector<8x96xf32>
    %71 = vector.broadcast %5 : vector<1x96xf32> to vector<8x96xf32>
    %72 = arith.addf %70, %71 : vector<8x96xf32>
    %73 = vector.extract_strided_slice %19 {offsets = [0, 32], sizes = [8, 64], strides = [1, 1]} : vector<8x128xf32> to vector<8x64xf32>
    %c0_21 = arith.constant 0 : index
    %c0_22 = arith.constant 0 : index
    %74 = vector.load %arg10[%c0_21, %c0_22] : memref<8x256xf32, #tpu.memory_space<vmem>>, vector<8x64xf32>
    tpu.vector_store %arg10[%c0_21, %c0_22], %73 {strides = array<i32>} : memref<8x256xf32, #tpu.memory_space<vmem>>, vector<8x64xf32>,
    %c0_23 = arith.constant 0 : index
    %c128 = arith.constant 128 : index
    %75 = vector.load %arg10[%c0_23, %c128] : memref<8x256xf32, #tpu.memory_space<vmem>>, vector<8x96xf32>
    tpu.vector_store %arg10[%c0_23, %c128], %72 {strides = array<i32>} : memref<8x256xf32, #tpu.memory_space<vmem>>, vector<8x96xf32>,
    %c0_24 = arith.constant 0 : index
    %c64 = arith.constant 64 : index
    %76 = vector.load %arg9[%c0_24, %c64] : memref<8x128xf32, #tpu.memory_space<vmem>>, vector<8x8xf32>
    tpu.vector_store %arg9[%c0_24, %c64], %65 {strides = array<i32>} : memref<8x128xf32, #tpu.memory_space<vmem>>, vector<8x8xf32>,
    %c0_25 = arith.constant 0 : index
    %c72 = arith.constant 72 : index
    %77 = vector.load %arg9[%c0_25, %c72] : memref<8x128xf32, #tpu.memory_space<vmem>>, vector<8x16xf32>
    tpu.vector_store %arg9[%c0_25, %c72], %60 {strides = array<i32>} : memref<8x128xf32, #tpu.memory_space<vmem>>, vector<8x16xf32>,
    %cst_26 = arith.constant 0.000000e+00 : f32
    %78 = vector.broadcast %cst_26 : f32 to vector<8x40xf32>
    %c0_27 = arith.constant 0 : index
    %c88 = arith.constant 88 : index
    %79 = vector.load %arg9[%c0_27, %c88] : memref<8x128xf32, #tpu.memory_space<vmem>>, vector<8x40xf32>
    tpu.vector_store %arg9[%c0_27, %c88], %78 {strides = array<i32>} : memref<8x128xf32, #tpu.memory_space<vmem>>, vector<8x40xf32>,
    %80 = tpu.iota {dimensions = array<i32: 1>} : vector<8x32xi32>
    %c15_i32 = arith.constant 15 : i32
    %81 = vector.broadcast %c15_i32 : i32 to vector<8x32xi32>
    %82 = arith.andi %80, %81 : vector<8x32xi32>
    %c8_i32_28 = arith.constant 8 : i32
    %83 = vector.broadcast %c8_i32_28 : i32 to vector<8x32xi32>
    %84 = arith.cmpi slt, %82, %83 : vector<8x32xi32>
    %c0_29 = arith.constant 0 : index
    %c0_30 = arith.constant 0 : index
    %85 = vector.load %arg11[%c0_29, %c0_30] : memref<8x32xf32, #tpu.memory_space<vmem>>, vector<8x32xf32>
    %c0_i32_31 = arith.constant 0 : i32
    %c8_i32_32 = arith.constant 8 : i32
    %86 = arith.muli %c0_i32_31, %c8_i32_32 : i32
    %87 = tpu.assume_multiple %86, 8 : i32
    %88 = arith.index_cast %87 : i32 to index
    %c0_33 = arith.constant 0 : index
    %89 = vector.load %arg10[%88, %c0_33] : memref<8x256xf32, #tpu.memory_space<vmem>>, vector<8x64xf32>
    %90 = arith.index_cast %87 : i32 to index
    %c128_34 = arith.constant 128 : index
    %91 = vector.load %arg10[%90, %c128_34] : memref<8x256xf32, #tpu.memory_space<vmem>>, vector<8x96xf32>
    %c0_35 = arith.constant 0 : index
    %c0_36 = arith.constant 0 : index
    %92 = vector.load %arg6[%c0_35, %c0_36] : memref<32x224xf32, #tpu.memory_space<vmem>>, vector<32x224xf32>
    %cst_37 = arith.constant dense<0.000000e+00> : vector<8x224xf32>
    %93 = tpu.matmul %85, %92, %cst_37 {dimension_numbers = #tpu.dot_dimension_numbers<[1], [0], [0], [1], [0, 0, 1, 1], [], []>} : vector<8x32xf32>, vector<32x224xf32>, vector<8x224xf32> -> vector<8x224xf32>
    %94 = vector.extract_strided_slice %93 {offsets = [0, 0], sizes = [8, 64], strides = [1, 1]} : vector<8x224xf32> to vector<8x64xf32>
    %95 = arith.addf %89, %94 : vector<8x64xf32>
    %cst_38 = arith.constant dense<0.000000e+00> : vector<64xf32>
    %96 = vector.multi_reduction <add>, %95, %cst_38 [0] : vector<8x64xf32> to vector<64xf32>
    %97 = vector.shape_cast %96 : vector<64xf32> to vector<1x64xf32>
    %cst_39 = arith.constant 8.000000e+00 : f32
    %98 = vector.broadcast %cst_39 : f32 to vector<1x64xf32>
    %99 = arith.divf %97, %98 : vector<1x64xf32>
    %100 = vector.broadcast %99 : vector<1x64xf32> to vector<8x64xf32>
    %101 = arith.subf %95, %100 : vector<8x64xf32>
    %102 = arith.mulf %101, %101 : vector<8x64xf32>
    %cst_40 = arith.constant dense<0.000000e+00> : vector<64xf32>
    %103 = vector.multi_reduction <add>, %102, %cst_40 [0] : vector<8x64xf32> to vector<64xf32>
    %104 = vector.shape_cast %103 : vector<64xf32> to vector<1x64xf32>
    %cst_41 = arith.constant 8.000000e+00 : f32
    %105 = vector.broadcast %cst_41 : f32 to vector<1x64xf32>
    %106 = arith.divf %104, %105 : vector<1x64xf32>
    %107 = vector.broadcast %99 : vector<1x64xf32> to vector<8x64xf32>
    %108 = arith.subf %95, %107 : vector<8x64xf32>
    %cst_42 = arith.constant 9.99999974E-6 : f32
    %109 = vector.broadcast %cst_42 : f32 to vector<1x64xf32>
    %110 = arith.addf %106, %109 : vector<1x64xf32>
    %111 = math.rsqrt %110 : vector<1x64xf32>
    %112 = vector.broadcast %111 : vector<1x64xf32> to vector<8x64xf32>
    %113 = arith.mulf %108, %112 : vector<8x64xf32>
    %114 = vector.broadcast %11 : vector<1x64xf32> to vector<8x64xf32>
    %115 = arith.mulf %113, %114 : vector<8x64xf32>
    %116 = vector.broadcast %12 : vector<1x64xf32> to vector<8x64xf32>
    %117 = arith.addf %115, %116 : vector<8x64xf32>
    %cst_43 = arith.constant 0.000000e+00 : f32
    %118 = vector.broadcast %cst_43 : f32 to vector<8x64xf32>
    %119 = arith.cmpf ogt, %117, %118 : vector<8x64xf32>
    %cst_44 = arith.constant 0.00999999977 : f32
    %120 = vector.broadcast %cst_44 : f32 to vector<8x64xf32>
    %121 = arith.mulf %120, %117 : vector<8x64xf32>
    %122 = arith.select %119, %117, %121 : vector<8x64xi1>, vector<8x64xf32>
    %c0_45 = arith.constant 0 : index
    %c0_46 = arith.constant 0 : index
    %123 = vector.load %arg7[%c0_45, %c0_46] : memref<64x32xf32, #tpu.memory_space<vmem>>, vector<64x32xf32>
    %cst_47 = arith.constant dense<0.000000e+00> : vector<8x32xf32>
    %124 = tpu.matmul %122, %123, %cst_47 {dimension_numbers = #tpu.dot_dimension_numbers<[1], [0], [0], [1], [0, 0, 1, 1], [], []>} : vector<8x64xf32>, vector<64x32xf32>, vector<8x32xf32> -> vector<8x32xf32>
    %125 = vector.broadcast %7 : vector<1x32xf32> to vector<8x32xf32>
    %126 = arith.addf %124, %125 : vector<8x32xf32>
    %127 = math.exp %126 : vector<8x32xf32>
    %cst_48 = arith.constant 2.000000e-03 : f32
    %128 = vector.broadcast %cst_48 : f32 to vector<8x32xf32>
    %129 = arith.maximumf %127, %128 : vector<8x32xf32>
    %130 = arith.select %84, %126, %129 : vector<8x32xi1>, vector<8x32xf32>
    %131 = vector.extract_strided_slice %93 {offsets = [0, 128], sizes = [8, 96], strides = [1, 1]} : vector<8x224xf32> to vector<8x96xf32>
    %132 = vector.broadcast %8 : vector<1x96xf32> to vector<8x96xf32>
    %133 = arith.addf %131, %132 : vector<8x96xf32>
    %134 = vector.extract_strided_slice %91 {offsets = [0, 0], sizes = [8, 64], strides = [1, 1]} : vector<8x96xf32> to vector<8x64xf32>
    %135 = vector.extract_strided_slice %133 {offsets = [0, 0], sizes = [8, 64], strides = [1, 1]} : vector<8x96xf32> to vector<8x64xf32>
    %136 = arith.addf %134, %135 : vector<8x64xf32>
    %137 = arith.negf %136 : vector<8x64xf32>
    %138 = math.exp %137 : vector<8x64xf32>
    %cst_49 = arith.constant 1.000000e+00 : f32
    %139 = vector.broadcast %cst_49 : f32 to vector<8x64xf32>
    %140 = arith.addf %139, %138 : vector<8x64xf32>
    %141 = arith.divf %139, %140 : vector<8x64xf32>
    %142 = vector.extract_strided_slice %141 {offsets = [0, 0], sizes = [8, 32], strides = [1, 1]} : vector<8x64xf32> to vector<8x32xf32>
    %143 = vector.extract_strided_slice %141 {offsets = [0, 32], sizes = [8, 32], strides = [1, 1]} : vector<8x64xf32> to vector<8x32xf32>
    %144 = vector.extract_strided_slice %91 {offsets = [0, 64], sizes = [8, 32], strides = [1, 1]} : vector<8x96xf32> to vector<8x32xf32>
    %145 = vector.extract_strided_slice %133 {offsets = [0, 64], sizes = [8, 32], strides = [1, 1]} : vector<8x96xf32> to vector<8x32xf32>
    %146 = arith.mulf %142, %145 : vector<8x32xf32>
    %147 = arith.addf %144, %146 : vector<8x32xf32>
    %148 = math.tanh %147 : vector<8x32xf32>
    %cst_50 = arith.constant 1.000000e+00 : f32
    %149 = vector.broadcast %cst_50 : f32 to vector<8x32xf32>
    %150 = arith.subf %149, %143 : vector<8x32xf32>
    %151 = arith.mulf %150, %148 : vector<8x32xf32>
    %152 = arith.mulf %143, %85 : vector<8x32xf32>
    %153 = arith.addf %151, %152 : vector<8x32xf32>
    %154 = arith.index_cast %87 : i32 to index
    %c0_51 = arith.constant 0 : index
    %155 = vector.load %arg9[%154, %c0_51] : memref<8x128xf32, #tpu.memory_space<vmem>>, vector<8x32xf32>
    tpu.vector_store %arg9[%154, %c0_51], %153 {strides = array<i32>} : memref<8x128xf32, #tpu.memory_space<vmem>>, vector<8x32xf32>,
    %156 = arith.index_cast %87 : i32 to index
    %c32 = arith.constant 32 : index
    %157 = vector.load %arg9[%156, %c32] : memref<8x128xf32, #tpu.memory_space<vmem>>, vector<8x32xf32>
    tpu.vector_store %arg9[%156, %c32], %130 {strides = array<i32>} : memref<8x128xf32, #tpu.memory_space<vmem>>, vector<8x32xf32>,
    %c1_i32 = arith.constant 1 : i32
    %c0_52 = arith.constant 0 : index
    %c0_53 = arith.constant 0 : index
    %158 = vector.load %arg11[%c0_52, %c0_53] : memref<8x32xf32, #tpu.memory_space<vmem>>, vector<8x32xf32>
    tpu.vector_store %arg11[%c0_52, %c0_53], %153 {strides = array<i32>} : memref<8x32xf32, #tpu.memory_space<vmem>>, vector<8x32xf32>,
    return
  }
  func.func @transform_0(%arg0: i32) -> (i32, i32) {
    %c0_i32 = arith.constant 0 : i32
    %c0_i32_0 = arith.constant 0 : i32
    return %arg0, %c0_i32 : i32, i32
  }
  func.func @transform_1(%arg0: i32) -> (i32, i32) {
    %c0_i32 = arith.constant 0 : i32
    %c0_i32_0 = arith.constant 0 : i32
    %c0_i32_1 = arith.constant 0 : i32
    return %c0_i32, %c0_i32_0 : i32, i32
  }
  func.func @transform_2(%arg0: i32) -> (i32, i32) {
    %c0_i32 = arith.constant 0 : i32
    %c0_i32_0 = arith.constant 0 : i32
    %c0_i32_1 = arith.constant 0 : i32
    return %c0_i32, %c0_i32_0 : i32, i32
  }
  func.func @transform_3(%arg0: i32) -> (i32, i32) {
    %c0_i32 = arith.constant 0 : i32
    %c0_i32_0 = arith.constant 0 : i32
    %c0_i32_1 = arith.constant 0 : i32
    return %c0_i32, %c0_i32_0 : i32, i32
  }
  func.func @transform_4(%arg0: i32) -> (i32, i32) {
    %c0_i32 = arith.constant 0 : i32
    %c0_i32_0 = arith.constant 0 : i32
    %c0_i32_1 = arith.constant 0 : i32
    return %c0_i32, %c0_i32_0 : i32, i32
  }
  func.func @transform_5(%arg0: i32) -> (i32, i32) {
    %c0_i32 = arith.constant 0 : i32
    %c0_i32_0 = arith.constant 0 : i32
    %c0_i32_1 = arith.constant 0 : i32
    return %c0_i32, %c0_i32_0 : i32, i32
  }
  func.func @transform_6(%arg0: i32) -> (i32, i32) {
    %c0_i32 = arith.constant 0 : i32
    %c0_i32_0 = arith.constant 0 : i32
    %c0_i32_1 = arith.constant 0 : i32
    return %c0_i32, %c0_i32_0 : i32, i32
  }
  func.func @transform_7(%arg0: i32) -> (i32, i32) {
    %c0_i32 = arith.constant 0 : i32
    %c0_i32_0 = arith.constant 0 : i32
    %c0_i32_1 = arith.constant 0 : i32
    return %c0_i32, %c0_i32_0 : i32, i32
  }
  func.func @transform_8(%arg0: i32) -> (i32, i32) {
    %c0_i32 = arith.constant 0 : i32
    %c0_i32_0 = arith.constant 0 : i32
    return %arg0, %c0_i32 : i32, i32
  }
}

</mosaic_0001>

<bundles_post_ra>
// kernel: role_learner_forward.1
= control target key start
LH: loop header
LB: loop body
LE: loop exit
PB: predicated region body
PF: predicated region fallthrough
CT: control target
= control target key end

     0   :  { %v771_v0 = vmov 0.0|0.0   ;;  %vm772_vm0 = vmmov 0   ;;  %v773_v3 = vmov 0.0   ;;  %v41_v4 = vlaneseq  ;;  %s774_s12 = smov 96   ;;  %s778_s16 = smov 16   ;;  %s1013_s2 = inlined_call_operand.vmem [shape: f32[16,128], index: 2, kind: input, shape index: {}]   ;;  %s1014_s0 = inlined_call_operand.vmem [shape: f32[8,128], index: 0, kind: input, shape index: {}]   ;;  %s1015_s7 = inlined_call_operand.vmem [shape: f32[8,256], index: 7, kind: input, shape index: {}]   ;;  %s1016_s4 = inlined_call_operand.vmem [shape: f32[32,16], index: 4, kind: input, shape index: {}]   ;;  %s1017_s5 = inlined_call_operand.vmem [shape: f32[32,224], index: 5, kind: input, shape index: {}]   ;;  %s1018_s1 = inlined_call_operand.vmem [shape: f32[8,32], index: 1, kind: input, shape index: {}]   ;;  %s1019_s3 = inlined_call_operand.vmem [shape: f32[32,96], index: 3, kind: input, shape index: {}]   ;;  %s1020_s6 = inlined_call_operand.vmem [shape: f32[64,32], index: 6, kind: input, shape index: {}]   ;;  %s1021_s8 = inlined_call_operand.vmem [shape: f32[8,128], index: 8, kind: output, shape index: {}]  }
   0x1   :  { %711 = vmatprep.subr.bf16.mxu1 %v771_v0  ;;  %v39_v1 = vld [vmem:[%s1013_s2] sm:$0xff]  ;;  %v40_v2 = vld [vmem:[%s1013_s2 + $0x8] sm:$0xff]  ;;  %667 = vmatprep.mubr.msk.f32.mxu1 %vm772_vm0, %v773_v3  ;;  %vm45_vm1 = vcmask 130048   ;;  %v157_v14 = vld [vmem:[%s1016_s4 + $0x10] sm:$0xff]  ;;  %vm34_vm2 = vcmask 261120   ;;  %s777_s2 = smov 120  }
   0x2   :  { %v712_v5 = vpack.c.bf16 %v40_v2, %v39_v1  ;;  %720 = vmatprep.subr.bf16.mxu0 %v771_v0  ;;  %689 = vmatprep.mubr.msk.f32.mxu0 %vm772_vm0, %v773_v3  ;;  %v838_v6 = vshrl.u32 %v41_v4, 7  ;;  %v38_v7 = vld [vmem:[%s1014_s0] sm:$0xff]  ;;  %v156_v12 = vld [vmem:[%s1016_s4 + $0x8] sm:$0xff]  ;;  %v158_v15 = vld [vmem:[%s1016_s4 + $0x18] sm:$0xff]  ;;  %vm347_vm4 = vcmask 523264   ;;  %vm349_vm5 = vcmask 785408  }
   0x3   :  { %v846_v8 = vld [vmem:[%s1015_s7] sm:$0xff]  ;;  %v718_v16 = vpack.c.bf16 %v158_v15, %v157_v14  ;;  %v374_v17 = vld [vmem:[%s1017_s5 + $0x8] sm:$0xff]  ;;  %v376_v18 = vld [vmem:[%s1017_s5 + $0x18] sm:$0xff]  ;;  %vm355_vm11 = vcmask 589312   ;;  %vm361_vm12 = vcmask 720448   ;;  %vm363_vm13 = vcmask 1048256  }
   0x4   :  { %713 = vmatpush3.bf16.msra.mxu1 %v712_v5  ;;  %v144_v9 = vsub.s32 3, %v838_v6  ;;  %v155_v11 = vld [vmem:[%s1016_s4] sm:$0xff]  ;;  %v726_v19 = vpack.c.bf16 %v376_v18, %v374_v17  ;;  %v265_v22 = vld [vmem:[%s1019_s3 + $0x8] sm:$0xff]  ;;  %v266_v23 = vld [vmem:[%s1019_s3 + $0x10] sm:$0xff]  ;;  %v43_v27 = vsub.s32 0, %v838_v6  ;;  %v161_v34 = vsub.s32 1, %v838_v6 }
   0x5   :  { %714 = vmatprep.subr.bf16.mxu1 %v771_v0  ;;  %v715_v13 = vpack.c.bf16 %v156_v12, %v155_v11  ;;  %v33_v20 = vld [vmem:[%s1018_s1] sm:$0xff]  ;;  %v267_v25 = vld [vmem:[%s1019_s3 + $0x18] sm:$0xff]  ;;  %s775_s1 = smov 32   ;;  %v375_v59 = vld [vmem:[%s1017_s5 + $0x10] sm:$0xff]  ;;  %vm628_vm14 = vcmask 523520  }
   0x6   :  { %v852_v10 = vrot.slane %v846_v8, %v144_v9  ;;  %35 = vst.msk [vmem:[#allocation3] sm:$0xff] %vm34_vm2, %v33_v20  ;;  %v264_v21 = vld [vmem:[%s1019_s3] sm:$0xff]  ;;  %v724_v26 = vpack.c.bf16 %v267_v25, %v266_v23  ;;  %v44_v28 = vrot.slane %v846_v8, %v43_v27  ;;  %s776_s3 = smov 64   ;;  %v906_v37 = vrot.slane %v846_v8, %v161_v34  ;;  %v378_v61 = vld [vmem:[%s1017_s5 + $0x28] sm:$0xff]  ;;  %v380_v62 = vld [vmem:[%s1017_s5 + $0x38] sm:$0xff] }
   0x7   :  { %668 = vmatmul.mubr.msk.f32.vlgmr.msra.gmra.mrb[0].mxu1 %vm45_vm1, %v38_v7  ;;  %v721_v24 = vpack.c.bf16 %v265_v22, %v264_v21  ;;  %v373_v58 = vld [vmem:[%s1017_s5] sm:$0xff]  ;;  %v730_v2 = vpack.c.bf16 %v380_v62, %v378_v61  ;;  %v490_v15 = vld [vmem:[%s1020_s6 + $0x8] sm:$0xff]  ;;  %v491_v17 = vld [vmem:[%s1020_s6 + $0x10] sm:$0xff] }
   0x8   :  { %678 = vmatprep.mubr.msk.f32.mxu1 %vm772_vm0, %v773_v3  ;;  %148 = vrot.lane.b32.xlu0 %v852_v10, %s774_s12  ;;  %v728_v1 = vpack.c.bf16 %v375_v59, %v373_v58  ;;  %v377_v5 = vld [vmem:[%s1017_s5 + $0x20] sm:$0xff]  ;;  %v492_v18 = vld [vmem:[%s1020_s6 + $0x18] sm:$0xff]  ;;  %v494_v21 = vld [vmem:[%s1020_s6 + $0x28] sm:$0xff] }
   0x9   :  { %716 = vmatpush3.bf16.msra.mxu1 %v715_v13  ;;  %722 = vmatpush3.bf16.msra.mxu0 %v721_v24  ;;  %v489_v14 = vld [vmem:[%s1020_s6] sm:$0xff]  ;;  %v495_v23 = vld [vmem:[%s1020_s6 + $0x30] sm:$0xff]  ;;  %v496_v24 = vld [vmem:[%s1020_s6 + $0x38] sm:$0xff] }
   0xa   :  { %717 = vmatprep.subr.bf16.mxu1 %v771_v0  ;;  %723 = vmatprep.subr.bf16.mxu0 %v771_v0  ;;  %v493_v20 = vld [vmem:[%s1020_s6 + $0x20] sm:$0xff]  ;;  %v744_v25 = vpack.c.bf16 %v496_v24, %v495_v23 }
   0xb   :  { %v741_v22 = vpack.c.bf16 %v494_v21, %v493_v20 }
   0xd   :  { %719 = vmatpush3.bf16.msra.mxu1 %v718_v16  ;;  %725 = vmatpush3.bf16.msra.mxu0 %v724_v26  ;;  %v933_v11 = vld [vmem:[#allocation3] sm:$0xff]  ;;  %v735_v16 = vpack.c.bf16 %v490_v15, %v489_v14  ;;  %v241_v15 = vand.u32 127, %v41_v4 }
   0xe   :  { %727 = vmatprep.subr.bf16.mxu1 %v726_v19  ;;  %734 = vmatprep.subr.bf16.mxu0 %v771_v0  ;;  %v738_v19 = vpack.c.bf16 %v492_v18, %v491_v17 }
   0xf   :  { %vm242_vm7 = vcmp.lt.s32.totalorder %v241_v15, 8 }
  0x7a   :  { %v149_v56 = vpop.permute.xlu0 %148 }
  0xda   :  { %v115_v29 = vpop.f32.mrb[0].mxu1 }
  0xdb   :  { %v116_v30 = vadd.f32 %v115_v29, %v44_v28  ;;  %v669_v31 = vpop.f32.mrb[1].mxu1  ;;  %v587_v28 = vsub.s32 2, %v838_v6 }
  0xdd   :  { %v120_v32 = vsel %vm34_vm2, %v116_v30, 0.0  ;;  %344 = vrot.lane.b32.xlu1 %v116_v30, %s774_s12  ;;  %v263_v33 = vmax.f32 %v116_v30, 0.0  ;;  %v588_v29 = vrot.slane %v846_v8, %v587_v28 }
  0xde   :  { %v121_v35 = vrot.slane %v120_v32, 4 }
  0xdf   :  { %269 = vrot.lane.b32.xlu0 %v263_v33, %s775_s1 }
  0xe0   :  { %v122_v36 = vadd.f32 %v121_v35, %v120_v32 }
  0xe1   :  { %477 = vrot.lane.b32.xlu1 %v852_v10, %s776_s3 }
  0xe2   :  { %v123_v38 = vrot.slane %v122_v36, 2 }
  0xe4   :  { %v124_v39 = vadd.f32 %v123_v38, %v122_v36 }
  0xe5   :  { %164 = vrot.lane.b32.xlu1 %v906_v37, %s775_s1 }
  0xe6   :  { %v125_v40 = vrot.slane %v124_v39, 1 }
  0xe8   :  { %v126_v41 = vadd.f32 %v125_v40, %v124_v39  ;;  %v37_v40 = vld [vmem:[%s1015_s7 + $0x8] sm:$0xff]  ;;  %s779_s7 = smov 72  }
  0xe9   :  { %254 = vrot.lane.b32.xlu1 %v38_v7, %s777_s2  ;;  %v379_v7 = vld [vmem:[%s1017_s5 + $0x30] sm:$0xff] }
  0xea   :  { %v128_v42 = vmul.f32 0.125, %v126_v41 }
  0xec   :  { %v129_v43 = vsub.f32 %v116_v30, %v128_v42  ;;  %v500_v42 = vrot.slane %v37_v40, %v161_v34  ;;  %v483_v34 = vsub.s32 4, %v838_v6  ;;  %v365_v40 = vand.u32 15, %v241_v15 }
  0xee   :  { %v130_v44 = vmul.f32 %v129_v43, %v129_v43  ;;  %504 = vrot.lane.b32.xlu1 %v500_v42, %s778_s16  ;;  %v484_v59 = vrot.slane %v846_v8, %v483_v34  ;;  %vm366_vm10 = vcmp.lt.s32.totalorder %v365_v40, 8 }
  0xf0   :  { %v131_v45 = vsel %vm34_vm2, %v130_v44, 0.0 }
  0xf1   :  { %v132_v46 = vrot.slane %v131_v45, 4 }
  0xf3   :  { %v133_v47 = vadd.f32 %v132_v46, %v131_v45 }
  0xf5   :  { %v134_v48 = vrot.slane %v133_v47, 2 }
  0xf7   :  { %v135_v49 = vadd.f32 %v134_v48, %v133_v47 }
  0xf9   :  { %v136_v50 = vrot.slane %v135_v49, 1 }
  0xfb   :  { %v137_v51 = vadd.f32 %v136_v50, %v135_v49 }
  0xfd   :  { %v138_v52 = vmul.f32 0.125, %v137_v51 }
  0xff   :  { %v139_v53 = vadd.f32 1e-05, %v138_v52 }
 0x101   :  { %755 = vrsqrt.f32 %v139_v53 }
 0x10b   :  { %v756_v54 = vpop.eup %755 }
 0x10c   :  { %v141_v55 = vmul.f32 %v756_v54, %v129_v43 }
 0x10e   :  { %v146_v57 = vmul.f32 %v852_v10, %v141_v55  ;;  %v732_v10 = vpack.c.bf16 %v379_v7, %v377_v5 }
 0x110   :  { %v151_v60 = vadd.f32 %v149_v56, %v146_v57 }
 0x112   :  { %vm152_vm3 = vcmp.gt.f32.partialorder %v151_v60, 0.0  ;;  %v153_v63 = vmul.f32 0.01, %v151_v60 }
 0x114   :  { %v154_v9 = vsel %vm152_vm3, %v151_v60, %v153_v63 }
 0x115   :  { %679 = vmatmul.mubr.msk.f32.vlgmr.msra.gmra.mrb[2].mxu1 %vm34_vm2, %v154_v9 }
 0x116   :  { %729 = vmatpush1.bf16.msra.mxu1 %v728_v1  ;;  %448 = vmatprep.mubr.f32.mxu1 %v773_v3 }
 0x117   :  { %731 = vmatprep.subr.bf16.mxu1 %v730_v2 }
 0x11a   :  { %733 = vmatpush1.bf16.msra.mxu1 %v732_v10 }
 0x11d   :  { %638 = vmatmul.mubr.msk.f32.vlgmr.msra.gmra.mrb[4].mxu1 %vm34_vm2, %v933_v11 }
 0x14f   :  { %v345_v12 = vpop.permute.xlu1 %344 }
 0x150   :  { %348 = vst.msk [vmem:[#allocation2] sm:$0xff] %vm347_vm4, %v345_v12 }
 0x151   :  { %v270_v13 = vpop.permute.xlu0 %269 }
 0x152   :  { %690 = vmatmul.mubr.msk.f32.vlgmr.msra.gmra.mrb[0].mxu0 %vm34_vm2, %v270_v13 }
 0x153   :  { %708 = vmatprep.mubr.msk.f32.mxu0 %vm772_vm0, %v773_v3  ;;  %736 = vmatpush3.bf16.msra.mxu0 %v735_v16  ;;  %v478_v60 = vpop.permute.xlu1 %477 }
 0x154   :  { %737 = vmatprep.subr.bf16.mxu0 %v771_v0 }
 0x157   :  { %739 = vmatpush3.bf16.msra.mxu0 %v738_v19  ;;  %v371_v30 = vld [vmem:[#allocation2] sm:$0xff]  ;;  %v165_v9 = vpop.permute.xlu1 %164 }
 0x158   :  { %740 = vmatprep.subr.bf16.mxu0 %v771_v0 }
 0x15b   :  { %742 = vmatpush3.bf16.msra.mxu0 %v741_v22 }
 0x15c   :  { %743 = vmatprep.subr.bf16.mxu0 %v771_v0 }
 0x15f   :  { %745 = vmatpush3.bf16.msra.mxu0 %v744_v25 }
 0x1e8   :  { %v236_v26 = vpop.f32.mrb[2].mxu1 }
 0x1e9   :  { %v680_v27 = vpop.f32.mrb[3].mxu1  ;;  %v237_v6 = vadd.f32 %v236_v26, %v165_v9 }
 0x1ea   :  { %v255_v27 = vpop.permute.xlu1 %254 }
 0x1eb   :  { %v243_v10 = vmul.f32 1.442695, %v237_v6 }
 0x1f0   :  { %v450_v31 = vpop.f32.mrb[4].mxu1 }
 0x1f1   :  { %v455_v32 = vadd.f32 %v450_v31, %v371_v30  ;;  %v452_v0 = vpop.f32.mrb[5].mxu1 }
 0x1f2   :  { %v589_v33 = vadd.f32 %v588_v29, %v452_v0 }
 0x1f3   :  { %v456_v35 = vsel %vm347_vm4, %v455_v32, 0.0 }
 0x1f4   :  { %v457_v36 = vrot.slane %v456_v35, 4  ;;  %598 = vrot.lane.b32.xlu0 %v589_v33, %s776_s3 }
 0x1f6   :  { %v458_v38 = vadd.f32 %v457_v36, %v456_v35 }
 0x1f8   :  { %v459_v39 = vrot.slane %v458_v38, 2 }
 0x1fa   :  { %v460_v41 = vadd.f32 %v459_v39, %v458_v38 }
 0x1fc   :  { %v461_v43 = vrot.slane %v460_v41, 1 }
 0x1fe   :  { %v462_v44 = vadd.f32 %v461_v43, %v460_v41 }
 0x200   :  { %v463_v45 = vmul.f32 0.125, %v462_v44 }
 0x202   :  { %v464_v46 = vsub.f32 %v455_v32, %v463_v45 }
 0x204   :  { %v465_v47 = vmul.f32 %v464_v46, %v464_v46 }
 0x206   :  { %v466_v48 = vsel %vm347_vm4, %v465_v47, 0.0 }
 0x207   :  { %v467_v49 = vrot.slane %v466_v48, 4 }
 0x209   :  { %v468_v50 = vadd.f32 %v467_v49, %v466_v48 }
 0x20b   :  { %v469_v51 = vrot.slane %v468_v50, 2 }
 0x20d   :  { %v470_v52 = vadd.f32 %v469_v51, %v468_v50 }
 0x20f   :  { %v471_v53 = vrot.slane %v470_v52, 1 }
 0x211   :  { %v472_v54 = vadd.f32 %v471_v53, %v470_v52 }
 0x213   :  { %v473_v55 = vmul.f32 0.125, %v472_v54 }
 0x215   :  { %v474_v56 = vadd.f32 1e-05, %v473_v55 }
 0x217   :  { %757 = vrsqrt.f32 %v474_v56 }
 0x218   :  { %759 = vpow2.f32 %v243_v10 }
 0x221   :  { %v758_v57 = vpop.eup %757 }
 0x222   :  { %v476_v58 = vmul.f32 %v758_v57, %v464_v46  ;;  %v760_v14 = vpop.eup %759 }
 0x223   :  { %v245_v16 = vmax.f32 %v760_v14, 0.002 }
 0x224   :  { %v480_v61 = vmul.f32 %v478_v60, %v476_v58 }
 0x225   :  { %v339_v62 = vpop.f32.mrb[0].mxu0  ;;  %v246_v18 = vsel %vm242_vm7, %v237_v6, %v245_v16 }
 0x226   :  { %v485_v63 = vadd.f32 %v484_v59, %v480_v61  ;;  %v340_v1 = vadd.f32 %v339_v62, %v906_v37  ;;  %v691_v2 = vpop.f32.mrb[1].mxu0  ;;  %vm249_vm8 = vcmp.eq.f32.partialorder %v246_v18, inf  ;;  %v252_v26 = vand.u32 2147483648, %v246_v18 }
 0x227   :  { %vm251_vm9 = vcmp.eq.f32.partialorder %v246_v18, 0.0 }
 0x228   :  { %350 = vst.msk [vmem:[#allocation2 + $0x8] sm:$0xff] %vm349_vm5, %v340_v1  ;;  %vm486_vm6 = vcmp.gt.f32.partialorder %v485_v63, 0.0  ;;  %v487_v5 = vmul.f32 0.01, %v485_v63 }
 0x22a   :  { %v488_v7 = vsel %vm486_vm6, %v485_v63, %v487_v5 }
 0x22b   :  { %709 = vmatmul.mubr.msk.f32.vlgmr.msra.gmra.mrb[2].mxu0 %vm347_vm4, %v488_v7 }
 0x22f   :  { %v372_v12 = vld [vmem:[#allocation2 + $0x8] sm:$0xff] }
 0x230   :  { %v590_v13 = vadd.f32 %v589_v33, %v372_v12 }
 0x232   :  { %v640_v8 = vmul.f32 -1.442695, %v590_v13 }
 0x234   :  { %761 = vpow2.f32 %v640_v8 }
 0x235   :  { %763 = vrsqrt.f32 %v246_v18 }
 0x23e   :  { %v762_v17 = vpop.eup %761 }
 0x23f   :  { %v594_v19 = vadd.f32 1.0, %v762_v17  ;;  %v764_v20 = vpop.eup %763 }
 0x240   :  { %v248_v21 = vmul.f32 %v764_v20, %v246_v18 }
 0x241   :  { %765 = vrcp.f32 %v594_v19 }
 0x242   :  { %v250_v25 = vsel %vm249_vm8, %v246_v18, %v248_v21 }
 0x243   :  { %v253_v4 = vsel %vm251_vm9, %v252_v26, %v250_v25 }
 0x244   :  { %v257_v28 = vmul.f32 %v255_v27, %v253_v4 }
 0x24b   :  { %v766_v22 = vpop.eup %765 }
 0x24c   :  { %v608_v45 = vsub.f32 1.0, %v766_v22 }
 0x266   :  { %v599_v23 = vpop.permute.xlu0 %598 }
 0x267   :  { %v601_v24 = vmul.f32 %v766_v22, %v599_v23 }
 0x269   :  { %603 = vrot.lane.b32.xlu0 %v601_v24, %s776_s3 }
 0x26d   :  { %502 = vrot.lane.b32.xlu0 %v906_v37, %s778_s16  ;;  %v505_v37 = vpop.permute.xlu1 %504 }
 0x271   :  { %259 = vrot.lane.b32.xlu0 %v257_v28, %s777_s2 }
 0x275   :  { %614 = vrot.lane.b32.xlu0 %v933_v11, %s775_s1 }
 0x279   :  { %358 = vrot.lane.b32.xlu0 %v246_v18, %s779_s7 }
 0x2db   :  { %v604_v29 = vpop.permute.xlu0 %603 }
 0x2dc   :  { %v606_v30 = vadd.f32 %v604_v29, %v372_v12 }
 0x2de   :  { %767 = vtanh.f32 %v606_v30 }
 0x2df   :  { %v503_v31 = vpop.permute.xlu0 %502 }
 0x2e0   :  { %v506_v35 = vsel %vm45_vm1, %v503_v31, %v505_v37 }
 0x2e3   :  { %v260_v0 = vpop.permute.xlu0 %259 }
 0x2e4   :  { %v262_v33 = vadd.f32 %v260_v0, %v246_v18 }
 0x2e7   :  { %v615_v44 = vpop.permute.xlu0 %614 }
 0x2e8   :  { %v768_v32 = vpop.eup %767  ;;  %v617_v47 = vmul.f32 %v766_v22, %v615_v44 }
 0x2e9   :  { %610 = vrot.lane.b32.xlu1 %v768_v32, %s774_s12 }
 0x2eb   :  { %v359_v51 = vpop.permute.xlu0 %358 }
 0x2ed   :  { %352 = vrot.lane.b32.xlu1 %v262_v33, %s776_s3 }
 0x2fe   :  { %v577_v36 = vpop.f32.mrb[2].mxu0 }
 0x2ff   :  { %v578_v38 = vadd.f32 %v577_v36, %v506_v35  ;;  %v710_v39 = vpop.f32.mrb[3].mxu0 }
 0x301   :  { %v581_v11 = vmul.f32 1.442695, %v578_v38 }
 0x303   :  { %769 = vpow2.f32 %v581_v11 }
 0x30d   :  { %v770_v41 = vpop.eup %769 }
 0x30e   :  { %v583_v42 = vmax.f32 %v770_v41, 0.002 }
 0x310   :  { %v584_v43 = vsel %vm366_vm10, %v578_v38, %v583_v42 }
 0x311   :  { %625 = vrot.lane.b32.xlu0 %v584_v43, %s775_s1 }
 0x35b   :  { %v611_v46 = vpop.permute.xlu1 %610 }
 0x35c   :  { %v613_v48 = vmul.f32 %v611_v46, %v608_v45 }
 0x35e   :  { %v618_v49 = vadd.f32 %v617_v47, %v613_v48 }
 0x35f   :  { %v353_v50 = vpop.permute.xlu1 %352 }
 0x360   :  { %356 = vst.msk [vmem:[%s1021_s8] sm:$0xff] %vm355_vm11, %v353_v50  ;;  %620 = vrot.lane.b32.xlu1 %v618_v49, %s774_s12 }
 0x361   :  { %362 = vst.msk [vmem:[%s1021_s8] sm:$0xff] %vm361_vm12, %v359_v51 }
 0x362   :  { %364 = vst.msk [vmem:[%s1021_s8] sm:$0xff] %vm363_vm13, %v773_v3 }
 0x383   :  { %v626_v53 = vpop.permute.xlu0 %625 }
 0x3d2   :  { %v621_v52 = vpop.permute.xlu1 %620 }
 0x3d3   :  { %623 = vst.msk [vmem:[%s1021_s8] sm:$0xff] %vm34_vm2, %v621_v52  ;;  %630 = vst.msk [vmem:[#allocation3] sm:$0xff] %vm34_vm2, %v621_v52 }
 0x3d4   :  { %629 = vst.msk [vmem:[%s1021_s8] sm:$0xff] %vm628_vm14, %v626_v53 }

</bundles_post_ra>
